<compile_context>
chip_gen: v6e
topology: v6e:2x2x1
jax: 0.10.0
libtpu: 0.0.40
codegen_flags: <defaults>
</compile_context>

<pallas_src>
from functools import partial
import math

import jax
import jax.numpy as jnp
from jax.experimental import pallas as pl
from jax.experimental.pallas import tpu as pltpu


# ----------------------------------------------------------------------------
# Kernels
# ----------------------------------------------------------------------------
def _ln_rows_kernel(x_ref, g_ref, b_ref, o_ref, *, eps, inv_d):
    """Standard layout: one tile of rows, full feature dim on the lane axis."""
    x = x_ref[...].astype(jnp.float32)                       # (tm, D)
    u = jnp.sum(x, axis=-1, keepdims=True) * inv_d            # mean
    xc = x - u
    v = jnp.sum(xc * xc, axis=-1, keepdims=True) * inv_d      # biased variance
    y = xc * jax.lax.rsqrt(v + eps)
    g = g_ref[...].astype(jnp.float32)
    b = b_ref[...].astype(jnp.float32)
    o_ref[...] = (g * y + b).astype(o_ref.dtype)


def _ln_packed_kernel(x_ref, g_ref, b_ref, seg_ref, o_ref, *, eps, inv_d):
    """Lane-packed layout: `pack` rows share one L-wide lane group (L = pack*D).

    seg_ref is an (L, L) bf16 block-diagonal 0/1 matrix; (x @ seg) broadcasts
    each row-segment's sum back across its own D lanes, so every vreg lane and
    every store stays full-width.  Precision: 2-pass hi/lo bf16 split per
    statistic (operands cast to bf16 explicitly -> one MXU pass per dot, f32
    accumulation).  The sum(x) and sum(x^2) dots are independent, so the four
    MXU passes issue back-to-back and hide under the tile DMA.
    Note: out-of-range rows of a partial last tile hold uninitialized VMEM;
    any NaN/Inf computed there stays row-local and is masked on store.
    """
    x = x_ref[...].astype(jnp.float32)                        # (tm, L)
    seg = seg_ref[...]                                        # (L, L) bf16, exact 0/1
    xx = x * x

    x_hi = x.astype(jnp.bfloat16)
    x_lo = (x - x_hi.astype(jnp.float32)).astype(jnp.bfloat16)
    xx_hi = xx.astype(jnp.bfloat16)
    xx_lo = (xx - xx_hi.astype(jnp.float32)).astype(jnp.bfloat16)

    s1 = (jnp.dot(x_hi, seg, preferred_element_type=jnp.float32)
          + jnp.dot(x_lo, seg, preferred_element_type=jnp.float32))
    s2 = (jnp.dot(xx_hi, seg, preferred_element_type=jnp.float32)
          + jnp.dot(xx_lo, seg, preferred_element_type=jnp.float32))

    u = s1 * inv_d
    # Biased variance via E[x^2] - mean^2; clamp tiny negative values from
    # cancellation (only relevant when |mean| >> std).
    v = jnp.maximum(s2 * inv_d - u * u, 0.0)
    y = (x - u) * jax.lax.rsqrt(v + eps)
    g = g_ref[...].astype(jnp.float32)
    b = b_ref[...].astype(jnp.float32)
    o_ref[...] = (g * y + b).astype(o_ref.dtype)


# ----------------------------------------------------------------------------
# Tiling / layout helpers
# ----------------------------------------------------------------------------
_COMPILER_PARAMS = pltpu.CompilerParams(
    dimension_semantics=("parallel",),
    vmem_limit_bytes=40 * 1024 * 1024,    # > 32 MiB scoped default, safe on v7x (64 MiB)
)


def _lane_target():
    """Lane-pack target: 128 on 128-wide-MXU chips (<= v5), 256 on v6e/v7x+."""
    try:
        kind = jax.devices()[0].device_kind.lower()
    except Exception:
        return 256
    if any(t in kind for t in ("v2", "v3", "v4", "v5")):
        return 128
    return 256


def _choose_pack(d, lane_target):
    """Rows folded into the lane axis so L = pack*d is a multiple of 128
    (grown toward lane_target). Returns 1 when packing is unnecessary or the
    minimal L would be too large (MXU pressure / seg size)."""
    if d % 128 == 0:
        return 1
    base = 128 // math.gcd(d, 128)        # smallest pack making L a multiple of 128
    if base * d > 512:
        return 1
    pack = base
    while pack * d < lane_target:
        pack *= 2
    return pack


def _pick_block_rows(rows, lane_width, itemsize):
    """Row-tile size under a VMEM budget that includes the f32 temporaries."""
    sub = max(8, 32 // itemsize)                    # sublane packing: f32->8, bf16->16
    lane_eff = ((lane_width + 127) // 128) * 128    # VMEM pads lanes to 128
    # in + out tiles (each double-buffered) plus ~6 f32 lane-wide temporaries
    # (x_f32, x*x, hi/lo splits, broadcast stats, y) materialized in the kernel.
    per_row_bytes = 4 * lane_eff * itemsize + 6 * lane_eff * 4
    io_budget = 12 * 1024 * 1024
    tm = max(sub, io_budget // per_row_bytes)
    tm = min(tm, 2048)
    if tm < rows:
        return max(sub, (tm // sub) * sub)
    # Whole array fits in one tile.  Only use grid=(1,) for tiny arrays;
    # otherwise split so DMA/compute pipeline (and both v7x cores get work).
    if rows * lane_eff * itemsize <= 2 * 1024 * 1024:
        return rows
    tm = ((max(sub, (rows + 3) // 4) + sub - 1) // sub) * sub   # target >= 4 blocks
    if tm >= rows:
        tm = ((rows // 2) // sub) * sub                          # at least 2 blocks
        if tm <= 0 or tm >= rows:
            return rows
    return tm


# ----------------------------------------------------------------------------
# Public wrapper
# ----------------------------------------------------------------------------
def layer_norm(x, gamma, beta, eps=1e-5, *, block_rows=None):
    """x: (batch, num_tokens, token_dim); gamma, beta: (token_dim,)."""
    B, T, D = x.shape
    rows = B * T
    itemsize = jnp.dtype(x.dtype).itemsize

    pack = _choose_pack(D, _lane_target())

    if pack > 1:
        L = pack * D
        x2 = x.reshape(rows, D)
        pad = (-rows) % pack
        if pad:
            # Pad a few rows so every small-D case stays on the lane-dense path.
            x2 = jnp.concatenate([x2, jnp.zeros((pad, D), x.dtype)], axis=0)
        rows_p = (rows + pad) // pack
        x2 = x2.reshape(rows_p, L)                             # contiguous, free reshape
        g2 = jnp.tile(gamma.reshape(1, D), (1, pack))          # (1, L)
        b2 = jnp.tile(beta.reshape(1, D), (1, pack))
        lane_id = jnp.arange(L, dtype=jnp.int32) // D
        seg = (lane_id[:, None] == lane_id[None, :]).astype(jnp.bfloat16)  # exact 0/1

        tm = block_rows if block_rows is not None else _pick_block_rows(rows_p, L, itemsize)
        grid = (pl.cdiv(rows_p, tm),)

        out = pl.pallas_call(
            partial(_ln_packed_kernel, eps=float(eps), inv_d=1.0 / float(D)),
            out_shape=jax.ShapeDtypeStruct((rows_p, L), x.dtype),
            grid_spec=pltpu.PrefetchScalarGridSpec(
                num_scalar_prefetch=0,
                grid=grid,
                in_specs=[
                    pl.BlockSpec((tm, L), lambda i: (i, 0)),
                    pl.BlockSpec((1, L), lambda i: (0, 0)),
                    pl.BlockSpec((1, L), lambda i: (0, 0)),
                    pl.BlockSpec((L, L), lambda i: (0, 0)),
                ],
                out_specs=pl.BlockSpec((tm, L), lambda i: (i, 0)),
            ),
            compiler_params=_COMPILER_PARAMS,
        )(x2, g2, b2, seg)
        out = out.reshape(rows_p * pack, D)
        if pad:
            out = out[:rows]
        return out.reshape(B, T, D)

    # Standard path: feature dim on the lane axis (best when D % 128 == 0).
    x2 = x.reshape(rows, D)
    g2 = gamma.reshape(1, D)
    b2 = beta.reshape(1, D)

    tm = block_rows if block_rows is not None else _pick_block_rows(rows, D, itemsize)
    grid = (pl.cdiv(rows, tm),)

    out = pl.pallas_call(
        partial(_ln_rows_kernel, eps=float(eps), inv_d=1.0 / float(D)),
        out_shape=jax.ShapeDtypeStruct((rows, D), x.dtype),
        grid_spec=pltpu.PrefetchScalarGridSpec(
            num_scalar_prefetch=0,
            grid=grid,
            in_specs=[
                pl.BlockSpec((tm, D), lambda i: (i, 0)),
                pl.BlockSpec((1, D), lambda i: (0, 0)),
                pl.BlockSpec((1, D), lambda i: (0, 0)),
            ],
            out_specs=pl.BlockSpec((tm, D), lambda i: (i, 0)),
        ),
        compiler_params=_COMPILER_PARAMS,
    )(x2, g2, b2)
    return out.reshape(B, T, D)


def layer_norm_ref(x, gamma, beta, eps=1e-5):
    u = jnp.mean(x, axis=-1, keepdims=True)
    v = jnp.mean((x - u) ** 2, axis=-1, keepdims=True)   # biased variance
    xn = (x - u) / jnp.sqrt(v + eps)
    return gamma * xn + beta


# ----------------------------------------------------------------------------
# Self-test
# ----------------------------------------------------------------------------
if __name__ == "__main__":
    key = jax.random.PRNGKey(0)

    def _check(batch, num_tokens, token_dim, k, block_rows=None):
        kx, kg, kb = jax.random.split(k, 3)
        x = jax.random.normal(kx, (batch, num_tokens, token_dim), dtype=jnp.float32)
        gamma = 1.0 + 0.1 * jax.random.normal(kg, (token_dim,), dtype=jnp.float32)
        beta = 0.1 * jax.random.normal(kb, (token_dim,), dtype=jnp.float32)

        out = layer_norm(x, gamma, beta, eps=1e-5, block_rows=block_rows)
        out = jax.block_until_ready(out)
        ref = layer_norm_ref(x, gamma, beta, eps=1e-5)
        assert out.shape == (batch, num_tokens, token_dim)
        assert jnp.allclose(out, ref, atol=1e-5, rtol=1e-5), (
            f"mismatch for shape {(batch, num_tokens, token_dim)}"
        )

    k1, k2, k3, k4 = jax.random.split(key, 4)
    # Module-spec shape (batch, num_tokens, token_dim): lane-packed path, D=32.
    _check(2, 8, 32, k1)
    # D multiple of 128: standard lane-dense path.
    _check(2, 8, 256, k2)
    # Multi-step grid on the packed path (explicit small block).
    _check(4, 64, 32, k3, block_rows=16)
    # Rows not a multiple of the pack factor: exercises the pad-and-slice path.
    _check(3, 7, 32, k4)

    print("KERNEL_OK")
</pallas_src>

<mosaic_0001>
module attributes {stable_mosaic.version = 11 : i64} {
  func.func @_ln_packed_kernel(%arg0: i32, %arg1: memref<2x256xf32, #tpu.memory_space<vmem>>, %arg2: memref<1x256xf32, #tpu.memory_space<vmem>>, %arg3: memref<1x256xf32, #tpu.memory_space<vmem>>, %arg4: memref<256x256xbf16, #tpu.memory_space<vmem>>, %arg5: memref<2x256xf32, #tpu.memory_space<vmem>>) attributes {dimension_semantics = [#tpu.dimension_semantics<parallel>], iteration_bounds = array<i64: 1>, scalar_prefetch = 0 : i64, scratch_operands = 0 : i64, tpu.core_type = #tpu.core_type<tc>, window_params = [{transform_indices = @transform_0, window_bounds = array<i64: 2, 256>}, {pipeline_mode = #tpu.pipeline_mode<synchronous>, transform_indices = @transform_1, window_bounds = array<i64: 1, 256>}, {pipeline_mode = #tpu.pipeline_mode<synchronous>, transform_indices = @transform_2, window_bounds = array<i64: 1, 256>}, {pipeline_mode = #tpu.pipeline_mode<synchronous>, transform_indices = @transform_3, window_bounds = array<i64: 256, 256>}, {transform_indices = @transform_4, window_bounds = array<i64: 2, 256>}]} {
    %c0 = arith.constant 0 : index
    %c0_0 = arith.constant 0 : index
    %0 = vector.load %arg1[%c0, %c0_0] : memref<2x256xf32, #tpu.memory_space<vmem>>, vector<2x256xf32>
    %c0_1 = arith.constant 0 : index
    %c0_2 = arith.constant 0 : index
    %1 = vector.load %arg4[%c0_1, %c0_2] : memref<256x256xbf16, #tpu.memory_space<vmem>>, vector<256x256xbf16>
    %2 = arith.mulf %0, %0 : vector<2x256xf32>
    %3 = arith.truncf %0 : vector<2x256xf32> to vector<2x256xbf16>
    %4 = arith.extf %3 : vector<2x256xbf16> to vector<2x256xf32>
    %5 = arith.subf %0, %4 : vector<2x256xf32>
    %6 = arith.truncf %5 : vector<2x256xf32> to vector<2x256xbf16>
    %7 = arith.truncf %2 : vector<2x256xf32> to vector<2x256xbf16>
    %8 = arith.extf %7 : vector<2x256xbf16> to vector<2x256xf32>
    %9 = arith.subf %2, %8 : vector<2x256xf32>
    %10 = arith.truncf %9 : vector<2x256xf32> to vector<2x256xbf16>
    %cst = arith.constant dense<0.000000e+00> : vector<2x256xf32>
    %11 = tpu.matmul %3, %1, %cst {dimension_numbers = #tpu.dot_dimension_numbers<[1], [0], [0], [1], [0, 0, 1, 1], [], []>} : vector<2x256xbf16>, vector<256x256xbf16>, vector<2x256xf32> -> vector<2x256xf32>
    %cst_3 = arith.constant dense<0.000000e+00> : vector<2x256xf32>
    %12 = tpu.matmul %6, %1, %cst_3 {dimension_numbers = #tpu.dot_dimension_numbers<[1], [0], [0], [1], [0, 0, 1, 1], [], []>} : vector<2x256xbf16>, vector<256x256xbf16>, vector<2x256xf32> -> vector<2x256xf32>
    %13 = arith.addf %11, %12 : vector<2x256xf32>
    %cst_4 = arith.constant dense<0.000000e+00> : vector<2x256xf32>
    %14 = tpu.matmul %7, %1, %cst_4 {dimension_numbers = #tpu.dot_dimension_numbers<[1], [0], [0], [1], [0, 0, 1, 1], [], []>} : vector<2x256xbf16>, vector<256x256xbf16>, vector<2x256xf32> -> vector<2x256xf32>
    %cst_5 = arith.constant dense<0.000000e+00> : vector<2x256xf32>
    %15 = tpu.matmul %10, %1, %cst_5 {dimension_numbers = #tpu.dot_dimension_numbers<[1], [0], [0], [1], [0, 0, 1, 1], [], []>} : vector<2x256xbf16>, vector<256x256xbf16>, vector<2x256xf32> -> vector<2x256xf32>
    %16 = arith.addf %14, %15 : vector<2x256xf32>
    %cst_6 = arith.constant 3.125000e-02 : f32
    %17 = vector.broadcast %cst_6 : f32 to vector<2x256xf32>
    %18 = arith.mulf %13, %17 : vector<2x256xf32>
    %cst_7 = arith.constant 3.125000e-02 : f32
    %19 = vector.broadcast %cst_7 : f32 to vector<2x256xf32>
    %20 = arith.mulf %16, %19 : vector<2x256xf32>
    %21 = arith.mulf %18, %18 : vector<2x256xf32>
    %22 = arith.subf %20, %21 : vector<2x256xf32>
    %cst_8 = arith.constant 0.000000e+00 : f32
    %23 = vector.broadcast %cst_8 : f32 to vector<2x256xf32>
    %24 = arith.maximumf %22, %23 : vector<2x256xf32>
    %25 = arith.subf %0, %18 : vector<2x256xf32>
    %cst_9 = arith.constant 9.99999974E-6 : f32
    %26 = vector.broadcast %cst_9 : f32 to vector<2x256xf32>
    %27 = arith.addf %24, %26 : vector<2x256xf32>
    %28 = math.rsqrt %27 : vector<2x256xf32>
    %29 = arith.mulf %25, %28 : vector<2x256xf32>
    %c0_10 = arith.constant 0 : index
    %c0_11 = arith.constant 0 : index
    %30 = vector.load %arg2[%c0_10, %c0_11] : memref<1x256xf32, #tpu.memory_space<vmem>>, vector<1x256xf32>
    %c0_12 = arith.constant 0 : index
    %c0_13 = arith.constant 0 : index
    %31 = vector.load %arg3[%c0_12, %c0_13] : memref<1x256xf32, #tpu.memory_space<vmem>>, vector<1x256xf32>
    %32 = vector.broadcast %30 : vector<1x256xf32> to vector<2x256xf32>
    %33 = arith.mulf %32, %29 : vector<2x256xf32>
    %34 = vector.broadcast %31 : vector<1x256xf32> to vector<2x256xf32>
    %35 = arith.addf %33, %34 : vector<2x256xf32>
    %c0_14 = arith.constant 0 : index
    %c0_15 = arith.constant 0 : index
    %36 = vector.load %arg5[%c0_14, %c0_15] : memref<2x256xf32, #tpu.memory_space<vmem>>, vector<2x256xf32>
    tpu.vector_store %arg5[%c0_14, %c0_15], %35 {strides = array<i32>} : memref<2x256xf32, #tpu.memory_space<vmem>>, vector<2x256xf32>,
    return
  }
  func.func @transform_0(%arg0: i32) -> (i32, i32) {
    %c0_i32 = arith.constant 0 : i32
    %c0_i32_0 = arith.constant 0 : i32
    return %arg0, %c0_i32 : i32, i32
  }
  func.func @transform_1(%arg0: i32) -> (i32, i32) {
    %c0_i32 = arith.constant 0 : i32
    %c0_i32_0 = arith.constant 0 : i32
    %c0_i32_1 = arith.constant 0 : i32
    return %c0_i32, %c0_i32_0 : i32, i32
  }
  func.func @transform_2(%arg0: i32) -> (i32, i32) {
    %c0_i32 = arith.constant 0 : i32
    %c0_i32_0 = arith.constant 0 : i32
    %c0_i32_1 = arith.constant 0 : i32
    return %c0_i32, %c0_i32_0 : i32, i32
  }
  func.func @transform_3(%arg0: i32) -> (i32, i32) {
    %c0_i32 = arith.constant 0 : i32
    %c0_i32_0 = arith.constant 0 : i32
    %c0_i32_1 = arith.constant 0 : i32
    return %c0_i32, %c0_i32_0 : i32, i32
  }
  func.func @transform_4(%arg0: i32) -> (i32, i32) {
    %c0_i32 = arith.constant 0 : i32
    %c0_i32_0 = arith.constant 0 : i32
    return %arg0, %c0_i32 : i32, i32
  }
}

</mosaic_0001>

<bundles_post_ra>
// kernel: tpu_custom_call.1
= control target key start
LH: loop header
LB: loop body
LE: loop exit
PB: predicated region body
PF: predicated region fallthrough
CT: control target
= control target key end

     0   :  { %9 = vsyncpa [#allocation3], 0  ;;  %s1052_s0 = inlined_call_operand.hbm [shape: f32[2,256], index: 0, kind: input, shape index: {}]   ;;  %s1053_s1 = inlined_call_operand.hbm [shape: f32[1,256], index: 1, kind: input, shape index: {}]   ;;  %s1054_s2 = inlined_call_operand.vmem [shape: f32[1,256], index: 2, kind: input, shape index: {}]   ;;  %s1055_s3 = inlined_call_operand.hbm [shape: bf16[256,256], index: 3, kind: input, shape index: {}]   ;;  %s1056_s4 = inlined_call_operand.hbm [shape: f32[2,256], index: 4, kind: output, shape index: {}]  }
   0x1   :  { %10 = vsyncpa [#allocation6], 0 }
   0x2   :  { %11 = vsyncpa [#allocation4], 0  ;;  %s776_s15 = smov [#allocation5]   ;;  %s777_s17 = smov [#allocation2]  }
   0x3   :  { %s28_s16 = sshll.u32 %s776_s15, 4  ;;  %s18_s18 = sshll.u32 %s777_s17, 4  ;;  %s29_s16 = int_to_ptr.vmem [resolvable:$true] %s28_s16  ;;  %s19_s18 = int_to_ptr.vmem [resolvable:$true] %s18_s18 }
   0x4   :  { %s698_s19 = scalar_lea.vmem %s29_s16, 32  ;;  %p703_p1 = scmp.lt.s32.totalorder %s29_s16, %s29_s16 }
   0x5   :  { %p699_p0 = scmp.ne.s32.totalorder %s29_s16, %s698_s19  ;;  %p704_p2 = scmp.lt.s32.totalorder %s698_s19, %s698_s19 }
   0x7   :  { %p705_p3 = por %p704_p2, %p703_p1 }
   0x9   :  { %p706_p4 = pnand %p705_p3, %p699_p0 }
   0xb   :  { %709 = shalt.err (!%p706_p4)
}
   0xc   :  { %31 = dma.hbm_to_vmem [thread:$0]  %s1053_s1, 32, %s29_s16, [#allocation6]  }
   0xd   :  { %s718_s22 = scalar_lea.vmem %s19_s18, 64  ;;  %p723_p6 = scmp.lt.s32.totalorder %s19_s18, %s19_s18 }
   0xe   :  { %p719_p5 = scmp.ne.s32.totalorder %s19_s18, %s718_s22  ;;  %p724_p7 = scmp.lt.s32.totalorder %s718_s22, %s718_s22 }
  0x10   :  { %p725_p8 = por %p724_p7, %p723_p6 }
  0x12   :  { %p726_p9 = pnand %p725_p8, %p719_p5 }
  0x14   :  { %729 = shalt.err (!%p726_p9)
}
  0x15   :  { %21 = dma.hbm_to_vmem [thread:$0]  %s1052_s0, 64, %s19_s18, [#allocation3]  }
  0x16   :  { %s778_s25 = smov [#allocation7]  }
  0x17   :  { %s39_s26 = sshll.u32 %s778_s25, 4  ;;  %s40_s26 = int_to_ptr.vmem [resolvable:$true] %s39_s26 }
  0x18   :  { %s738_s27 = scalar_lea.vmem %s40_s26, 4096  ;;  %p743_p11 = scmp.lt.s32.totalorder %s40_s26, %s40_s26 }
  0x19   :  { %p739_p10 = scmp.ne.s32.totalorder %s40_s26, %s738_s27  ;;  %p744_p12 = scmp.lt.s32.totalorder %s738_s27, %s738_s27 }
  0x1b   :  { %p745_p13 = por %p744_p12, %p743_p11 }
  0x1d   :  { %p746_p0 = pnand %p745_p13, %p739_p10 }
  0x1f   :  { %749 = shalt.err (!%p746_p0)
}
  0x20   :  { %s779_s1 = smov 128   ;;  %s780_s28 = smov 8  }
  0x21   :  { %45 = dma.hbm_to_vmem [thread:$0]  %s1055_s3, 4096, %s40_s26, [#allocation6], %s779_s1, %s779_s1, %s780_s28  }
  0x22   :  { %770 = dma.done.wait [#allocation3], 64  }
  0x23   :  { %771 = vsyncadd [#allocation3], 4294967232 }
  0x24   :  { %772 = dma.done.wait [#allocation6], 4128  }
  0x25   :  { %773 = vsyncadd [#allocation6], 4294963168  ;;  %v817_v0 = vld [vmem:[#allocation7 + $0x74] ss:$8 sps:$4 sm:$0xff]   ;;  %v819_v1 = vld [vmem:[#allocation7 + $0x70] ss:$8 sps:$4 sm:$0xff]   ;;  %v93_v9 = vlaneseq }
  0x26   :  { %329 = vmatprep.subr.bf16.mxu0 %v817_v0  ;;  %370 = vmatprep.subr.bf16.mxu1 %v817_v0  ;;  %v823_v2 = vld [vmem:[#allocation7 + $0x64] ss:$8 sps:$4 sm:$0xff]   ;;  %v827_v3 = vld [vmem:[#allocation7 + $0x60] ss:$8 sps:$4 sm:$0xff]   ;;  %v831_v4 = vld [vmem:[#allocation7 + $0x54] ss:$8 sps:$4 sm:$0xff]  }
  0x27   :  { %330 = vmatpush1.bf16.msra.mxu0 %v819_v1  ;;  %371 = vmatpush1.bf16.msra.mxu1 %v819_v1  ;;  %v835_v5 = vld [vmem:[#allocation7 + $0x50] ss:$8 sps:$4 sm:$0xff]   ;;  %v839_v6 = vld [vmem:[#allocation7 + $0x44] ss:$8 sps:$4 sm:$0xff]   ;;  %v781_v7 = vmov 1983009808  }
  0x28   :  { %331 = vmatprep.subr.bf16.mxu0 %v823_v2  ;;  %372 = vmatprep.subr.bf16.mxu1 %v823_v2  ;;  %v91_v8 = vunpack.c.l.s4 %v781_v7  ;;  %v843_v10 = vld [vmem:[#allocation7 + $0x40] ss:$8 sps:$4 sm:$0xff]   ;;  %v847_v11 = vld [vmem:[#allocation7 + $0x34] ss:$8 sps:$4 sm:$0xff]   ;;  %v849_v13 = vshrl.u32 %v93_v9, 7  ;;  %s782_s5 = smov [#allocation8]  }
  0x29   :  { %v853_v14 = vld [vmem:[#allocation7 + $0x30] ss:$8 sps:$4 sm:$0xff]   ;;  %v857_v15 = vld [vmem:[#allocation7 + $0x24] ss:$8 sps:$4 sm:$0xff]   ;;  %v864_v17 = vld [vmem:[#allocation7 + $0x20] ss:$8 sps:$4 sm:$0xff]  }
  0x2a   :  { %v92_v12 = vunpack.c.0.s8 %v91_v8  ;;  %v868_v18 = vld [vmem:[#allocation7 + $0x14] ss:$8 sps:$4 sm:$0xff]   ;;  %v876_v21 = vld [vmem:[#allocation7 + $0x10] ss:$8 sps:$4 sm:$0xff]   ;;  %v880_v22 = vld [vmem:[#allocation7 + $0x4] ss:$8 sps:$4 sm:$0xff]  }
  0x2b   :  { %332 = vmatpush1.bf16.msra.mxu0 %v827_v3  ;;  %373 = vmatpush1.bf16.msra.mxu1 %v827_v3  ;;  %v870_v19 = vld [vmem:[#allocation2] sm:$0xf]  ;;  %v889_v28 = vld [vmem:[#allocation7] ss:$8 sps:$4 sm:$0xff]   ;;  %v902_v34 = vld [vmem:[#allocation7 + $0xe4] ss:$8 sps:$4 sm:$0xff]  }
  0x2c   :  { %333 = vmatprep.subr.bf16.mxu0 %v831_v4  ;;  %374 = vmatprep.subr.bf16.mxu1 %v831_v4  ;;  %v860_v16 = vsub.s32 %v92_v12, %v849_v13  ;;  %v88_v25 = vmul.f32 %v870_v19, %v870_v19  ;;  %v893_v29 = vld [vmem:[#allocation7 + $0xf4] ss:$8 sps:$4 sm:$0xff]   ;;  %v898_v33 = vld [vmem:[#allocation7 + $0xf0] ss:$8 sps:$4 sm:$0xff]   ;;  %v908_v38 = vld [vmem:[#allocation7 + $0xe0] ss:$8 sps:$4 sm:$0xff]  }
  0x2d   :  { %v912_v39 = vld [vmem:[#allocation7 + $0xd4] ss:$8 sps:$4 sm:$0xff]   ;;  %v919_v44 = vld [vmem:[#allocation7 + $0xd0] ss:$8 sps:$4 sm:$0xff]   ;;  %v923_v45 = vld [vmem:[#allocation7 + $0xc4] ss:$8 sps:$4 sm:$0xff]  }
  0x2e   :  { %v96_v20 = vrot.slane %v870_v19, %v860_v16  ;;  %v136_v31 = vrot.slane %v88_v25, %v860_v16  ;;  %v928_v49 = vld [vmem:[#allocation7 + $0xc0] ss:$8 sps:$4 sm:$0xff]   ;;  %v932_v50 = vld [vmem:[#allocation7 + $0xb4] ss:$8 sps:$4 sm:$0xff]   ;;  %v936_v52 = vld [vmem:[#allocation7 + $0xb0] ss:$8 sps:$4 sm:$0xff]  }
  0x2f   :  { %334 = vmatpush1.bf16.msra.mxu0 %v835_v5  ;;  %375 = vmatpush1.bf16.msra.mxu1 %v835_v5  ;;  %v940_v53 = vld [vmem:[#allocation7 + $0xa4] ss:$8 sps:$4 sm:$0xff]   ;;  %v945_v55 = vld [vmem:[#allocation7 + $0xa0] ss:$8 sps:$4 sm:$0xff]   ;;  %v949_v56 = vld [vmem:[#allocation7 + $0x94] ss:$8 sps:$4 sm:$0xff]  }
  0x30   :  { %335 = vmatprep.subr.bf16.mxu0 %v839_v6  ;;  %376 = vmatprep.subr.bf16.mxu1 %v839_v6  ;;  %v97_v23 = vcombine.high %v96_v20, %v96_v20  ;;  %v882_v24 = vpack.c.bf16 %v96_v20, %v96_v20  ;;  %v137_v36 = vcombine.high %v136_v31, %v136_v31  ;;  %v953_v58 = vld [vmem:[#allocation7 + $0x90] ss:$8 sps:$4 sm:$0xff]   ;;  %v957_v59 = vld [vmem:[#allocation7 + $0x84] ss:$8 sps:$4 sm:$0xff]   ;;  %v964_v61 = vld [vmem:[#allocation7 + $0x80] ss:$8 sps:$4 sm:$0xff]  }
  0x31   :  { %v915_v41 = vpack.c.bf16 %v136_v31, %v136_v31  ;;  %s588_s6 = sshll.u32 %s782_s5, 4  ;;  %s589_s6 = int_to_ptr.vmem [resolvable:$true] %s588_s6 }
  0x32   :  { %v101_v26 = vpack.c.bf16 %v97_v23, %v97_v23  ;;  %v102_v27 = vunpack.c.l.bf16 %v882_v24  ;;  %v141_v42 = vpack.c.bf16 %v137_v36, %v137_v36  ;;  %s750_s7 = scalar_lea.vmem %s589_s6, 64  ;;  %p755_p2 = scmp.lt.s32.totalorder %s589_s6, %s589_s6 }
  0x33   :  { %336 = vmatpush1.bf16.msra.mxu0 %v843_v10  ;;  %377 = vmatpush1.bf16.msra.mxu1 %v843_v10  ;;  %v142_v47 = vunpack.c.l.bf16 %v915_v41  ;;  %p751_p1 = scmp.ne.s32.totalorder %s589_s6, %s750_s7  ;;  %p756_p3 = scmp.lt.s32.totalorder %s750_s7, %s750_s7 }
  0x34   :  { %337 = vmatprep.subr.bf16.mxu0 %v847_v11  ;;  %378 = vmatprep.subr.bf16.mxu1 %v847_v11  ;;  %v103_v30 = vunpack.c.l.bf16 %v101_v26  ;;  %v143_v48 = vunpack.c.l.bf16 %v141_v42 }
  0x35   :  { %402 = vmatprep.mubr.bf16.mxu1 %v101_v26  ;;  %p757_p4 = por %p756_p3, %p755_p2 }
  0x36   :  { %v106_v32 = vcombine.low %v102_v27, %v103_v30  ;;  %v146_v51 = vcombine.low %v142_v47, %v143_v48 }
  0x37   :  { %338 = vmatpush1.bf16.msra.mxu0 %v853_v14  ;;  %379 = vmatpush1.bf16.msra.mxu1 %v853_v14  ;;  %p758_p5 = pnand %p757_p4, %p751_p1 }
  0x38   :  { %339 = vmatprep.subr.bf16.mxu0 %v857_v15  ;;  %380 = vmatprep.subr.bf16.mxu1 %v857_v15  ;;  %v113_v35 = vrot.slane %v106_v32, %v860_v16  ;;  %v153_v54 = vrot.slane %v146_v51, %v860_v16 }
  0x3a   :  { %v115_v37 = vsub.f32 %v870_v19, %v113_v35  ;;  %v155_v57 = vsub.f32 %v88_v25, %v153_v54 }
  0x3b   :  { %340 = vmatpush1.bf16.msra.mxu0 %v864_v17  ;;  %381 = vmatpush1.bf16.msra.mxu1 %v864_v17 }
  0x3c   :  { %341 = vmatprep.subr.bf16.mxu0 %v868_v18  ;;  %382 = vmatprep.subr.bf16.mxu1 %v868_v18  ;;  %v123_v40 = vrot.slane %v115_v37, %v860_v16  ;;  %v960_v60 = vrot.slane %v155_v57, %v860_v16 }
  0x3e   :  { %v124_v43 = vcombine.high %v123_v40, %v123_v40  ;;  %v164_v62 = vcombine.high %v960_v60, %v960_v60  ;;  %v127_v63 = vpack.c.bf16 %v123_v40, %v123_v40 }
  0x3f   :  { %342 = vmatpush1.bf16.msra.mxu0 %v876_v21  ;;  %383 = vmatpush1.bf16.msra.mxu1 %v876_v21 }
  0x40   :  { %343 = vmatprep.subr.bf16.mxu0 %v880_v22  ;;  %384 = vmatprep.subr.bf16.mxu1 %v880_v22  ;;  %v128_v46 = vpack.c.bf16 %v124_v43, %v124_v43  ;;  %v168_v7 = vpack.c.bf16 %v164_v62, %v164_v62  ;;  %v531_v43 = vld [vmem:[#allocation5] sm:$0x3] }
  0x42   :  { %361 = vmatprep.mubr.bf16.mxu0 %v128_v46  ;;  %v540_v46 = vsub.s32 1, %v849_v13 }
  0x43   :  { %344 = vmatpush1.bf16.msra.mxu0 %v889_v28  ;;  %385 = vmatpush1.bf16.msra.mxu1 %v889_v28 }
  0x44   :  { %345 = vmatprep.subr.bf16.mxu0 %v893_v29  ;;  %386 = vmatprep.subr.bf16.mxu1 %v893_v29 }
  0x47   :  { %346 = vmatpush2.bf16.msra.mxu0 %v898_v33  ;;  %387 = vmatpush2.bf16.msra.mxu1 %v898_v33 }
  0x48   :  { %347 = vmatprep.subr.bf16.mxu0 %v902_v34  ;;  %388 = vmatprep.subr.bf16.mxu1 %v902_v34 }
  0x4b   :  { %348 = vmatpush2.bf16.msra.mxu0 %v908_v38  ;;  %389 = vmatpush2.bf16.msra.mxu1 %v908_v38 }
  0x4c   :  { %349 = vmatprep.subr.bf16.mxu0 %v912_v39  ;;  %390 = vmatprep.subr.bf16.mxu1 %v912_v39 }
  0x4f   :  { %350 = vmatpush2.bf16.msra.mxu0 %v919_v44  ;;  %391 = vmatpush2.bf16.msra.mxu1 %v919_v44 }
  0x50   :  { %351 = vmatprep.subr.bf16.mxu0 %v923_v45  ;;  %392 = vmatprep.subr.bf16.mxu1 %v923_v45 }
  0x53   :  { %352 = vmatpush2.bf16.msra.mxu0 %v928_v49  ;;  %393 = vmatpush2.bf16.msra.mxu1 %v928_v49 }
  0x54   :  { %353 = vmatprep.subr.bf16.mxu0 %v932_v50  ;;  %394 = vmatprep.subr.bf16.mxu1 %v932_v50 }
  0x57   :  { %354 = vmatpush2.bf16.msra.mxu0 %v936_v52  ;;  %395 = vmatpush2.bf16.msra.mxu1 %v936_v52 }
  0x58   :  { %355 = vmatprep.subr.bf16.mxu0 %v940_v53  ;;  %396 = vmatprep.subr.bf16.mxu1 %v940_v53 }
  0x5b   :  { %356 = vmatpush2.bf16.msra.mxu0 %v945_v55  ;;  %397 = vmatpush2.bf16.msra.mxu1 %v945_v55 }
  0x5c   :  { %357 = vmatprep.subr.bf16.mxu0 %v949_v56  ;;  %398 = vmatprep.subr.bf16.mxu1 %v949_v56 }
  0x5f   :  { %358 = vmatpush2.bf16.msra.mxu0 %v953_v58  ;;  %399 = vmatpush2.bf16.msra.mxu1 %v953_v58 }
  0x60   :  { %359 = vmatprep.subr.bf16.mxu0 %v957_v59  ;;  %400 = vmatprep.subr.bf16.mxu1 %v957_v59 }
  0x63   :  { %360 = vmatpush2.bf16.msra.mxu0 %v964_v61  ;;  %401 = vmatpush2.bf16.msra.mxu1 %v964_v61 }
  0x64   :  { %411 = vmatprep.subr.bf16.mxu0 %v817_v0  ;;  %452 = vmatprep.subr.bf16.mxu1 %v817_v0  ;;  %v167_v0 = vpack.c.bf16 %v960_v60, %v960_v60 }
  0x66   :  { %362 = vmatmul.mubr.bf16.vlgmr.msra.gmra.mxu0 %v127_v63  ;;  %403 = vmatmul.mubr.bf16.vlgmr.msra.gmra.mxu1 %v882_v24 }
  0x67   :  { %412 = vmatpush1.bf16.msra.mxu0 %v819_v1  ;;  %453 = vmatpush1.bf16.msra.mxu1 %v819_v1 }
  0x68   :  { %413 = vmatprep.subr.bf16.mxu0 %v823_v2  ;;  %454 = vmatprep.subr.bf16.mxu1 %v823_v2 }
  0x69   :  { %443 = vmatprep.mubr.bf16.mxu0 %v168_v7  ;;  %484 = vmatprep.mubr.bf16.mxu1 %v141_v42  ;;  %v536_v42 = vsub.s32 0, %v849_v13 }
  0x6b   :  { %414 = vmatpush1.bf16.msra.mxu0 %v827_v3  ;;  %455 = vmatpush1.bf16.msra.mxu1 %v827_v3  ;;  %v537_v48 = vrot.slane %v531_v43, %v536_v42 }
  0x6c   :  { %415 = vmatprep.subr.bf16.mxu0 %v831_v4  ;;  %456 = vmatprep.subr.bf16.mxu1 %v831_v4 }
  0x6f   :  { %416 = vmatpush1.bf16.msra.mxu0 %v835_v5  ;;  %457 = vmatpush1.bf16.msra.mxu1 %v835_v5 }
  0x70   :  { %417 = vmatprep.subr.bf16.mxu0 %v839_v6  ;;  %458 = vmatprep.subr.bf16.mxu1 %v839_v6 }
  0x73   :  { %418 = vmatpush1.bf16.msra.mxu0 %v843_v10  ;;  %459 = vmatpush1.bf16.msra.mxu1 %v843_v10 }
  0x74   :  { %419 = vmatprep.subr.bf16.mxu0 %v847_v11  ;;  %460 = vmatprep.subr.bf16.mxu1 %v847_v11 }
  0x77   :  { %420 = vmatpush1.bf16.msra.mxu0 %v853_v14  ;;  %461 = vmatpush1.bf16.msra.mxu1 %v853_v14 }
  0x78   :  { %421 = vmatprep.subr.bf16.mxu0 %v857_v15  ;;  %462 = vmatprep.subr.bf16.mxu1 %v857_v15 }
  0x7b   :  { %422 = vmatpush1.bf16.msra.mxu0 %v864_v17  ;;  %463 = vmatpush1.bf16.msra.mxu1 %v864_v17 }
  0x7c   :  { %423 = vmatprep.subr.bf16.mxu0 %v868_v18  ;;  %464 = vmatprep.subr.bf16.mxu1 %v868_v18 }
  0x7f   :  { %424 = vmatpush1.bf16.msra.mxu0 %v876_v21  ;;  %465 = vmatpush1.bf16.msra.mxu1 %v876_v21 }
  0x80   :  { %425 = vmatprep.subr.bf16.mxu0 %v880_v22  ;;  %466 = vmatprep.subr.bf16.mxu1 %v880_v22 }
  0x83   :  { %426 = vmatpush1.bf16.msra.mxu0 %v889_v28  ;;  %467 = vmatpush1.bf16.msra.mxu1 %v889_v28 }
  0x84   :  { %427 = vmatprep.subr.bf16.mxu0 %v893_v29  ;;  %468 = vmatprep.subr.bf16.mxu1 %v893_v29 }
  0x87   :  { %428 = vmatpush2.bf16.msra.mxu0 %v898_v33  ;;  %469 = vmatpush2.bf16.msra.mxu1 %v898_v33 }
  0x88   :  { %429 = vmatprep.subr.bf16.mxu0 %v902_v34  ;;  %470 = vmatprep.subr.bf16.mxu1 %v902_v34 }
  0x8b   :  { %430 = vmatpush2.bf16.msra.mxu0 %v908_v38  ;;  %471 = vmatpush2.bf16.msra.mxu1 %v908_v38 }
  0x8c   :  { %431 = vmatprep.subr.bf16.mxu0 %v912_v39  ;;  %472 = vmatprep.subr.bf16.mxu1 %v912_v39 }
  0x8f   :  { %432 = vmatpush2.bf16.msra.mxu0 %v919_v44  ;;  %473 = vmatpush2.bf16.msra.mxu1 %v919_v44 }
  0x90   :  { %433 = vmatprep.subr.bf16.mxu0 %v923_v45  ;;  %474 = vmatprep.subr.bf16.mxu1 %v923_v45 }
  0x93   :  { %434 = vmatpush2.bf16.msra.mxu0 %v928_v49  ;;  %475 = vmatpush2.bf16.msra.mxu1 %v928_v49  ;;  %v532_v49 = vld [vmem:[%s1054_s2] sm:$0x3] }
  0x94   :  { %435 = vmatprep.subr.bf16.mxu0 %v932_v50  ;;  %476 = vmatprep.subr.bf16.mxu1 %v932_v50  ;;  %v541_v50 = vrot.slane %v531_v43, %v540_v46  ;;  %v561_v54 = vrot.slane %v532_v49, %v536_v42 }
  0x97   :  { %436 = vmatpush2.bf16.msra.mxu0 %v936_v52  ;;  %477 = vmatpush2.bf16.msra.mxu1 %v936_v52 }
  0x98   :  { %437 = vmatprep.subr.bf16.mxu0 %v940_v53  ;;  %478 = vmatprep.subr.bf16.mxu1 %v940_v53 }
  0x9b   :  { %438 = vmatpush2.bf16.msra.mxu0 %v945_v55  ;;  %479 = vmatpush2.bf16.msra.mxu1 %v945_v55  ;;  %v565_v55 = vrot.slane %v532_v49, %v540_v46 }
  0x9c   :  { %439 = vmatprep.subr.bf16.mxu0 %v949_v56  ;;  %480 = vmatprep.subr.bf16.mxu1 %v949_v56 }
  0x9f   :  { %440 = vmatpush2.bf16.msra.mxu0 %v953_v58  ;;  %481 = vmatpush2.bf16.msra.mxu1 %v953_v58 }
  0xa0   :  { %441 = vmatprep.subr.bf16.mxu0 %v957_v59  ;;  %482 = vmatprep.subr.bf16.mxu1 %v957_v59 }
  0xa3   :  { %442 = vmatpush2.bf16.msra.mxu0 %v964_v61  ;;  %483 = vmatpush2.bf16.msra.mxu1 %v964_v61 }
  0xa6   :  { %444 = vmatmul.mubr.bf16.vlgmr.msra.gmra.mxu0 %v167_v0  ;;  %485 = vmatmul.mubr.bf16.vlgmr.msra.gmra.mxu1 %v915_v41 }
 0x126   :  { %v363_v1 = vpop.f32.mrf.mxu0  ;;  %v404_v2 = vpop.f32.mrf.mxu1 }
 0x127   :  { %v405_v3 = vadd.f32 %v404_v2, %v363_v1 }
 0x128   :  { %v365_v4 = vpop.f32.mrf.mxu0  ;;  %v406_v5 = vpop.f32.mrf.mxu1 }
 0x129   :  { %v407_v11 = vadd.f32 %v406_v5, %v365_v4  ;;  %v493_v12 = vmul.f32 0.03125, %v405_v3 }
 0x12a   :  { %v367_v6 = vpop.f32.mrf.mxu0  ;;  %v408_v8 = vpop.f32.mrf.mxu1 }
 0x12b   :  { %v494_v17 = vmul.f32 0.03125, %v407_v11  ;;  %v497_v22 = vmul.f32 %v493_v12, %v493_v12 }
 0x12c   :  { %v368_v9 = vpop.f32.mrf.mxu0  ;;  %v409_v10 = vpop.f32.mrf.mxu1 }
 0x12d   :  { %v498_v27 = vmul.f32 %v494_v17, %v494_v17  ;;  %v505_v37 = vcombine.low %v493_v12, %v494_v17 }
 0x12f   :  { %v512_v39 = vrot.slane %v505_v37, %v860_v16 }
 0x131   :  { %v514_v44 = vsub.f32 %v870_v19, %v512_v39 }
 0x166   :  { %v445_v14 = vpop.f32.mrf.mxu0  ;;  %v486_v15 = vpop.f32.mrf.mxu1 }
 0x167   :  { %v487_v18 = vadd.f32 %v486_v15, %v445_v14 }
 0x168   :  { %v447_v20 = vpop.f32.mrf.mxu0  ;;  %v488_v21 = vpop.f32.mrf.mxu1 }
 0x169   :  { %v495_v23 = vmul.f32 0.03125, %v487_v18  ;;  %v489_v24 = vadd.f32 %v488_v21, %v447_v20 }
 0x16a   :  { %v449_v25 = vpop.f32.mrf.mxu0  ;;  %v490_v26 = vpop.f32.mrf.mxu1 }
 0x16b   :  { %v499_v28 = vsub.f32 %v495_v23, %v497_v22  ;;  %v496_v29 = vmul.f32 0.03125, %v489_v24 }
 0x16c   :  { %v450_v30 = vpop.f32.mrf.mxu0  ;;  %v491_v31 = vpop.f32.mrf.mxu1 }
 0x16d   :  { %v501_v32 = vmax.f32 %v499_v28, 0.0  ;;  %v500_v33 = vsub.f32 %v496_v29, %v498_v27 }
 0x16f   :  { %v515_v34 = vadd.f32 1e-05, %v501_v32  ;;  %v502_v35 = vmax.f32 %v500_v33, 0.0 }
 0x171   :  { %v516_v36 = vadd.f32 1e-05, %v502_v35  ;;  %686 = vrsqrt.f32 %v515_v34 }
 0x173   :  { %688 = vrsqrt.f32 %v516_v36 }
 0x17e   :  { %v687_v38 = vpop.eup %686 }
 0x180   :  { %v689_v40 = vpop.eup %688 }
 0x181   :  { %v521_v41 = vcombine.low %v687_v38, %v689_v40 }
 0x183   :  { %v528_v45 = vrot.slane %v521_v41, %v860_v16 }
 0x185   :  { %v530_v47 = vmul.f32 %v528_v45, %v514_v44 }
 0x187   :  { %v551_v51 = vrot.slane %v530_v47, %v860_v16 }
 0x189   :  { %v552_v52 = vcombine.high %v551_v51, %v551_v51  ;;  %v555_v53 = vmul.f32 %v551_v51, %v537_v48 }
 0x18b   :  { %v556_v56 = vmul.f32 %v552_v52, %v541_v50  ;;  %v568_v19 = vadd.f32 %v561_v54, %v555_v53 }
 0x18d   :  { %v569_v57 = vadd.f32 %v565_v55, %v556_v56 }
 0x18f   :  { %v572_v58 = vcombine.low %v568_v19, %v569_v57 }
 0x191   :  { %630 = vst.sshfl [vmem:[#allocation8] sm:$0x33 pattern:$0x76325410] %v572_v58 }
 0x192   :  { %761 = shalt.err (!%p758_p5)
}
 0x193   :  { %591 = dma.vmem_to_hbm [thread:$0]  %s589_s6, 64, %s1056_s4, [#allocation4]  }
 0x194   :  { %774 = dma.done.wait [#allocation4], 64  }
 0x195   :  { %775 = vsyncadd [#allocation4], 4294967232 }
 0x196   :  { %595 = vsyncpa [#allocation3], 1 }
 0x197   :  { %596 = vsyncpa [#allocation6], 1 }
 0x198   :  { %597 = vsyncpa [#allocation4], 1 }

</bundles_post_ra>
